<compile_context>
chip_gen: v5e
topology: v5e:2x2
jax: 0.10.0
libtpu: 0.0.40
codegen_flags: <defaults>
</compile_context>

<pallas_src>
import math
import functools

import jax
import jax.numpy as jnp
from jax import lax
from jax.experimental import pallas as pl
from jax.experimental.pallas import tpu as pltpu


# ----------------------------------------------------------------------------
# Pallas kernel: fused GraphConv projections, lane-dense (2, tm) output.
#   z[0, :] = (x @ w_rel ).T          (segment-summed over incoming edges afterwards)
#   z[1, :] = (x @ w_root).T + b_rel  (per-node root term; bias folded here)
# ----------------------------------------------------------------------------
def _project_kernel(x_ref, w_ref, b_ref, z_ref):
    # (2, tm) <- contract w (F, 2) dim 0 with x (tm, F) dim 1; result rows are lane-dense.
    z = lax.dot_general(w_ref[...], x_ref[...],
                        dimension_numbers=(((0,), (1,)), ((), ())),
                        preferred_element_type=jnp.float32)
    z_ref[0:1, :] = z[0:1, :]                  # rel projection
    z_ref[1:2, :] = z[1:2, :] + b_ref[0]       # root projection + bias (scalar from SMEM)


def _vmem_budget_bytes():
    """(live-buffer budget, vmem_limit_bytes), chosen per TPU generation."""
    phys = None
    try:
        phys = getattr(pltpu.get_tpu_info(), "vmem_capacity_bytes", None)
    except Exception:
        phys = None
    if phys is None or phys <= (64 << 20):     # v7x: 64 MiB physical per TC (or unknown)
        return 24 << 20, 32 << 20
    return 48 << 20, 64 << 20                  # v5e / v6e: 128 MiB physical


def _pick_row_tile(n, f, itemsize, buf_budget_bytes):
    """Byte-sized row tile: double-buffered (tm, F) input + double-buffered (2, tm) f32 out."""
    lane_f = max(f, 128)                       # VMEM lane-pads F < 128 up to a full vreg row
    bytes_per_row = 2 * lane_f * itemsize + 2 * 2 * 4
    tm = buf_budget_bytes // bytes_per_row
    if tm >= n:
        return n                               # single block: block dims == array dims
    return int(max(128, (tm // 128) * 128))    # lane-dense output wants 128-multiples


def _row_axis_semantics(num_tiles):
    """CORE_PARALLEL on v7x (2 TCs/chip) when the row-tile grid splits evenly."""
    try:
        kind = jax.devices()[0].device_kind.lower()
    except Exception:
        kind = ""
    if "v7" in kind and num_tiles % 2 == 0:
        return (pltpu.CORE_PARALLEL,)
    return ("parallel",)


def graphconv_projection(x, w_rel, b_rel, w_root, *, row_tile=None, force_pallas=False):
    """Returns (z_rel, z_root_b), each (N,) f32: z_rel = x@w_rel, z_root_b = x@w_root + b."""
    n, f = x.shape
    w = jnp.concatenate([w_rel, w_root], axis=1).astype(jnp.float32)     # (F, 2), resident
    b = b_rel.reshape(-1)[:1].astype(jnp.float32)                        # (1,) scalar -> SMEM

    if f < 128 and not force_pallas:
        # Narrow features lane-pad 16x in VMEM and leave the MXU ~idle; XLA's fused
        # matvec+bias is already at the HBM roofline here.
        z = jnp.dot(x.astype(jnp.float32), w)                            # (N, 2)
        return z[:, 0], z[:, 1] + b[0]

    buf_budget, vmem_limit = _vmem_budget_bytes()
    tm = _pick_row_tile(n, f, x.dtype.itemsize, buf_budget) if row_tile is None else row_tile
    tm = min(int(tm), n)
    num_tiles = pl.cdiv(n, tm)

    # TODO(synk): if DMA issue latency is still exposed after tile growth, add
    #             pipeline_mode=pl.Buffered(3) on the X spec / Buffered(1) on the weight.
    z = pl.pallas_call(
        _project_kernel,
        out_shape=jax.ShapeDtypeStruct((2, n), jnp.float32),
        grid_spec=pltpu.PrefetchScalarGridSpec(
            num_scalar_prefetch=0,
            grid=(num_tiles,),
            in_specs=[
                pl.BlockSpec((tm, f), lambda i: (i, 0)),            # stream X in native dtype
                pl.BlockSpec((f, 2), lambda i: (0, 0)),             # tiny weight block, resident
                pl.BlockSpec(memory_space=pltpu.MemorySpace.SMEM),  # scalar bias in SMEM
            ],
            out_specs=pl.BlockSpec((2, tm), lambda i: (0, i)),      # lane-dense output block
        ),
        compiler_params=pltpu.CompilerParams(
            dimension_semantics=_row_axis_semantics(num_tiles),
            vmem_limit_bytes=vmem_limit),
    )(x, w, b)
    return z[0], z[1]


# ----------------------------------------------------------------------------
# PoolGraph forward (SAGPooling, ratio=0.5, GNN=GraphConv, nonlinearity=tanh)
# ----------------------------------------------------------------------------
def pool_graph_forward(x, edge_index, batch, params, *, num_graphs, nodes_per_graph,
                       ratio=0.5, row_tile=None, force_pallas=False):
    """Returns dict(x=..., edge_index=..., edge_mask=..., batch=..., perm=..., score=...).

    Assumes equal-sized graphs (nodes_per_graph each) so the kept-node count is static.
    """
    n = x.shape[0]
    src = edge_index[0]
    dst = edge_index[1]

    # --- hot path: GraphConv projections in Pallas (projection BEFORE aggregation) ---
    z_rel, z_root_b = graphconv_projection(
        x, params["w_rel"], params["b_rel"], params["w_root"],
        row_tile=row_tile, force_pallas=force_pallas)

    # Sparse O(E) aggregation of the already-projected scalar: agg[i] = sum_{(j->i)} z_rel[j].
    # Edges are pre-sorted by destination so the segment-sum lowers to a vectorized sorted
    # reduce instead of a serializing scatter-add with duplicate indices.
    # TODO(synk): for very large E this could move into a Pallas kernel using edge_index as
    #             scalar prefetch.
    e_order = jnp.argsort(dst)
    agg = jax.ops.segment_sum(z_rel[src[e_order]], dst[e_order],
                              num_segments=n, indices_are_sorted=True)

    score = jnp.tanh(agg + z_root_b)                               # (N,)

    # --- per-graph top-k selection (k = ceil(ratio * n_g)) ---
    k = int(math.ceil(ratio * nodes_per_graph))
    _, top = lax.top_k(score.reshape(num_graphs, nodes_per_graph), k)   # (G, k) local indices
    offsets = (jnp.arange(num_graphs, dtype=jnp.int32) * nodes_per_graph)[:, None]
    perm = (top.astype(jnp.int32) + offsets).reshape(-1)           # (G*k,) global indices

    # --- kept-node features scaled by their score (XLA fuses gather + broadcast multiply) ---
    s_sel = score[perm]                                            # (K,)
    x_out = x[perm] * s_sel.astype(x.dtype)[:, None]               # multiplier = 1.0
    batch_out = batch[perm]

    # --- filter_adj: keep edges whose endpoints are both kept, relabel ---
    # TODO(synk): PyG returns a dynamically sized edge_index; here invalid edges are marked -1
    #             and edge_mask is returned (static shapes required under jit).
    new_idx = jnp.full((n,), -1, jnp.int32).at[perm].set(
        jnp.arange(perm.shape[0], dtype=jnp.int32))
    src_new = new_idx[src]
    dst_new = new_idx[dst]
    edge_mask = (src_new >= 0) & (dst_new >= 0)
    edge_index_out = jnp.where(edge_mask[None, :],
                               jnp.stack([src_new, dst_new], axis=0),
                               -jnp.ones_like(edge_index))

    return {
        "x": x_out,
        "edge_index": edge_index_out,
        "edge_mask": edge_mask,
        "batch": batch_out,
        "perm": perm,
        "score": s_sel,
    }


# ----------------------------------------------------------------------------
# Deterministic parameter init (GraphConv(num_node_features, 1)):
#   lin_rel : Linear(F, 1, bias=True)  -> w_rel (F,1), b_rel (1,1)
#   lin_root: Linear(F, 1, bias=False) -> w_root (F,1)
# ----------------------------------------------------------------------------
def init_params(key, num_node_features):
    k1, k2, k3 = jax.random.split(key, 3)
    bound = 1.0 / math.sqrt(num_node_features)
    w_rel = jax.random.uniform(k1, (num_node_features, 1), jnp.float32, -bound, bound)
    b_rel = jax.random.uniform(k2, (1, 1), jnp.float32, -bound, bound)
    w_root = jax.random.uniform(k3, (num_node_features, 1), jnp.float32, -bound, bound)
    return {"w_rel": w_rel, "b_rel": b_rel, "w_root": w_root}


if __name__ == "__main__":
    key = jax.random.PRNGKey(0)

    num_graphs = 2
    nodes_per_graph = 128
    num_node_features = 128        # lane-dense feature width -> Pallas path is exercised
    edges_per_graph = 64

    N = num_graphs * nodes_per_graph

    k_x, k_p, *k_edges = jax.random.split(key, 2 + 2 * num_graphs)

    x = jax.random.normal(k_x, (N, num_node_features), jnp.float32)
    batch = jnp.repeat(jnp.arange(num_graphs, dtype=jnp.int32), nodes_per_graph)

    # Random intra-graph edges (src, dst) for each graph, concatenated.
    srcs, dsts = [], []
    for g in range(num_graphs):
        lo = g * nodes_per_graph
        srcs.append(jax.random.randint(k_edges[2 * g], (edges_per_graph,),
                                       lo, lo + nodes_per_graph, jnp.int32))
        dsts.append(jax.random.randint(k_edges[2 * g + 1], (edges_per_graph,),
                                       lo, lo + nodes_per_graph, jnp.int32))
    edge_index = jnp.stack([jnp.concatenate(srcs), jnp.concatenate(dsts)], axis=0)

    params = init_params(k_p, num_node_features)

    # row_tile=128 just exercises a >1-step grid at this toy size; at realistic N the
    # byte-based auto tile (tens of MiB of double-buffered VMEM) is used instead.
    fwd = jax.jit(functools.partial(pool_graph_forward,
                                    num_graphs=num_graphs,
                                    nodes_per_graph=nodes_per_graph,
                                    row_tile=128))
    out = fwd(x, edge_index, batch, params)
    jax.block_until_ready(out)

    K = num_graphs * int(math.ceil(0.5 * nodes_per_graph))
    assert out["x"].shape == (K, num_node_features)
    assert out["batch"].shape == (K,)
    assert out["edge_index"].shape == edge_index.shape

    # Pure-JAX reference of the GraphConv + tanh score (aggregate-then-project order).
    xsum = jnp.zeros_like(x).at[edge_index[1]].add(x[edge_index[0]])
    ref_score = jnp.tanh(xsum @ params["w_rel"][:, 0] + params["b_rel"][0, 0]
                         + x @ params["w_root"][:, 0])
    assert jnp.allclose(out["score"], ref_score[out["perm"]], atol=1e-4)
    assert jnp.allclose(out["x"], x[out["perm"]] * out["score"][:, None], atol=1e-4)

    print("KERNEL_OK")
</pallas_src>

<mosaic_0001>
module attributes {stable_mosaic.version = 11 : i64} {
  func.func @_project_kernel(%arg0: i32, %arg1: memref<128x128xf32, #tpu.memory_space<vmem>>, %arg2: memref<128x2xf32, #tpu.memory_space<vmem>>, %arg3: memref<1xf32, #tpu.memory_space<smem>>, %arg4: memref<2x128xf32, #tpu.memory_space<vmem>>) attributes {dimension_semantics = [#tpu.dimension_semantics<parallel>], iteration_bounds = array<i64: 2>, scalar_prefetch = 0 : i64, scratch_operands = 0 : i64, tpu.core_type = #tpu.core_type<tc>, window_params = [{transform_indices = @transform_0, window_bounds = array<i64: 128, 128>}, {pipeline_mode = #tpu.pipeline_mode<synchronous>, transform_indices = @transform_1, window_bounds = array<i64: 128, 2>}, {transform_indices = @transform_2, window_bounds = array<i64: 1>}, {transform_indices = @transform_3, window_bounds = array<i64: 2, 128>}]} {
    %c0 = arith.constant 0 : index
    %c0_0 = arith.constant 0 : index
    %0 = vector.load %arg2[%c0, %c0_0] : memref<128x2xf32, #tpu.memory_space<vmem>>, vector<128x2xf32>
    %c0_1 = arith.constant 0 : index
    %c0_2 = arith.constant 0 : index
    %1 = vector.load %arg1[%c0_1, %c0_2] : memref<128x128xf32, #tpu.memory_space<vmem>>, vector<128x128xf32>
    %cst = arith.constant dense<0.000000e+00> : vector<2x128xf32>
    %2 = tpu.matmul %0, %1, %cst {dimension_numbers = #tpu.dot_dimension_numbers<[0], [1], [1], [0], [0, 1, 1, 0], [], []>} : vector<128x2xf32>, vector<128x128xf32>, vector<2x128xf32> -> vector<2x128xf32>
    %3 = vector.extract_strided_slice %2 {offsets = [0, 0], sizes = [1, 128], strides = [1, 1]} : vector<2x128xf32> to vector<1x128xf32>
    %c0_3 = arith.constant 0 : index
    %c0_4 = arith.constant 0 : index
    %4 = vector.load %arg4[%c0_3, %c0_4] : memref<2x128xf32, #tpu.memory_space<vmem>>, vector<1x128xf32>
    tpu.vector_store %arg4[%c0_3, %c0_4], %3 {strides = array<i32>} : memref<2x128xf32, #tpu.memory_space<vmem>>, vector<1x128xf32>,
    %5 = vector.extract_strided_slice %2 {offsets = [1, 0], sizes = [1, 128], strides = [1, 1]} : vector<2x128xf32> to vector<1x128xf32>
    %c0_5 = arith.constant 0 : index
    %6 = memref.load %arg3[%c0_5] : memref<1xf32, #tpu.memory_space<smem>>
    %7 = vector.broadcast %6 : f32 to vector<1x128xf32>
    %8 = arith.addf %5, %7 : vector<1x128xf32>
    %c1 = arith.constant 1 : index
    %c0_6 = arith.constant 0 : index
    %9 = vector.load %arg4[%c1, %c0_6] : memref<2x128xf32, #tpu.memory_space<vmem>>, vector<1x128xf32>
    tpu.vector_store %arg4[%c1, %c0_6], %8 {strides = array<i32>} : memref<2x128xf32, #tpu.memory_space<vmem>>, vector<1x128xf32>,
    return
  }
  func.func @transform_0(%arg0: i32) -> (i32, i32) {
    %c0_i32 = arith.constant 0 : i32
    %c0_i32_0 = arith.constant 0 : i32
    return %arg0, %c0_i32 : i32, i32
  }
  func.func @transform_1(%arg0: i32) -> (i32, i32) {
    %c0_i32 = arith.constant 0 : i32
    %c0_i32_0 = arith.constant 0 : i32
    %c0_i32_1 = arith.constant 0 : i32
    return %c0_i32, %c0_i32_0 : i32, i32
  }
  func.func @transform_2(%arg0: i32) -> i32 {
    %c0_i32 = arith.constant 0 : i32
    %c0_i32_0 = arith.constant 0 : i32
    return %c0_i32 : i32
  }
  func.func @transform_3(%arg0: i32) -> (i32, i32) {
    %c0_i32 = arith.constant 0 : i32
    %c0_i32_0 = arith.constant 0 : i32
    return %c0_i32, %arg0 : i32, i32
  }
}

</mosaic_0001>

<bundles_post_ra>
// kernel: pool_graph_forward.1
= control target key start
LH: loop header
LB: loop body
LE: loop exit
PB: predicated region body
PF: predicated region fallthrough
CT: control target
= control target key end

     0   :  { %s652_s0 = inlined_call_operand.hbm [shape: f32[256,128], index: 0, kind: input, shape index: {}]   ;;  %s653_s1 = inlined_call_operand.vmem [shape: f32[128,2], index: 1, kind: input, shape index: {}]   ;;  %s654_s2 = inlined_call_operand.<no memory space> [shape: f32[1], index: 2, kind: input, shape index: {}]   ;;  %s655_s3 = inlined_call_operand.vmem [shape: f32[2,256], index: 3, kind: output, shape index: {}]  }
   0x1   :  { %8 = sst [smem:[#allocation2]] %s654_s2 }
   0x2   :  { %9 = vsyncpa [#allocation4], 0 }
   0x3   :  { %11 = vsyncpa [#allocation4 + $0x1], 0  ;;  %s494_s14 = smov 0   ;;  %s496_s15 = smov 0  }
   0x4   :  { %s498_s16 = smov 0   ;;  %s500_s17 = smov 0  }
   0x5 LB: > { %s513_s2 = sadd.s32 4294967295, %s467_s17   ;;  %s516_s18 = sadd.s32 1, %s467_s17   ;;  %s467_s17 = sphi %s500_s17, %s662_s17   ;;  %s463_s16 = sphi %s498_s16, %s661_s16   ;;  %s459_s15 = sphi %s496_s15, %s660_s15   ;;  %s455_s14 = sphi %s494_s14, %s659_s14  }
   0x6   : > { %s21_s19 = ssub.s32 %s467_s17, %s516_s18  ;;  %s24_s20 = sadd.s32 1, %s463_s16 }
   0x7   : > { %p22_p0 = scmp.eq.s32.totalorder %s21_s19, 0  ;;  %p31_p1 = scmp.ne.s32.totalorder %s463_s16, %s459_s15 }
   0x8   : > { %p32_p2 = scmp.eq.s32.totalorder %s467_s17, 0  ;;  %p37_p3 = scmp.ne.s32.totalorder %s459_s15, %s455_s14 }
   0x9   : > { %s526_s21 = scalar_select %p22_p0, %s463_s16, %s24_s20  }
   0xa   : > { %p528_p4 = por %p32_p2, %p31_p1  ;;  %p38_p5 = scmp.eq.s32.totalorder %s513_s2, 0 }
   0xb   : > { %p368_p6 = scmp.lt.s32.totalorder %s467_s17, 2  ;;  %s135_s24 = sand.u32 1, %s463_s16  }
   0xc   : > { %p534_p7 = por %p38_p5, %p37_p3  ;;  %s350_s25 = sshll.u32 %s135_s24, 7 }
   0xd   : > { %s358_s26 = sshll.u32 %s467_s17, 7  ;;  %s139_s30 = scalar_lea.vmem [#allocation3], %s350_s25 }
   0xe   : > { %s144_s29 = scalar_lea.hbm %s652_s0, %s358_s26  ;;  %s147_s4 = sshll.u32 %s139_s30, 4  ;;  %s148_s4 = int_to_ptr.vmem [resolvable:$true] %s147_s4 }
   0xf   : > { %s145_s5 = sshll.u32 %s144_s29, 4  ;;  %p545_p8 = pnand %p368_p6, %p528_p4  ;;  %s146_s5 = int_to_ptr.hbm [resolvable:$true] %s145_s5 }
  0x10   : > { %p353_p9 = scmp.ge.s32.totalorder %s467_s17, 1  ;;  %s136_s7 = scalar_lea.sflag [#allocation4], %s135_s24 }
  0x11   : > { %s403_s8 = sshra.s32 %s146_s5, 4  ;;  %p407_p11 = pneg %p545_p8  ;;  %s404_s8 = int_to_ptr.hbm [resolvable:$true] %s403_s8 }
  0x12   : > { %s405_s9 = scalar_lea.hbm %s404_s8, 128  ;;  %s410_s12 = scalar_lea.hbm %s652_s0, 256 }
  0x13   : > { %p406_p10 = scmp.ne.s32.totalorder %s404_s8, %s405_s9  ;;  %p411_p0 = scmp.lt.s32.totalorder %s404_s8, %s652_s0 }
  0x14   : > { %p412_p1 = scmp.lt.s32.totalorder %s410_s12, %s405_s9 }
  0x15   : > { %p408_p12 = pnand %p407_p11, %p406_p10 }
  0x16   : > { %p413_p2 = por %p412_p1, %p411_p0 }
  0x17   : > { %p409_p13 = pneg %p408_p12 }
  0x19   : > { %p414_p3 = pnand %p413_p2, %p409_p13 }
  0x1b   : > { %417 = shalt.err (!%p414_p3)
}
  0x1c   : > { %s469_s19 = smov 128   ;;  %s470_s20 = smov 8  }
  0x1d   : > { %367 = dma.hbm_to_vmem [thread:$0]  (!%p545_p8), %s146_s5, 2048, %s148_s4, %s136_s7, %s469_s19, %s469_s19, %s470_s20  }
  0x1e   : > { %p155_p4 = scmp.lt.s32.totalorder %s467_s17, 3 }
  0x20   : > { %p156_p5 = pnand %p353_p9, %p155_p4 }
  0x21   : > { %s161_s22 = sand.u32 (!%p156_p5), 1, %s459_s15  }
  0x22   : > { %159 = sbr.rel (%p156_p5) target bundleno = 335 (0x14f), region = 32  ;;  %s354_s24 = sshll.u32 (!%p156_p5), %s161_s22, 7 }
  0x23   : > { %s162_s25 = scalar_lea.sflag (!%p156_p5), [#allocation4], %s161_s22  ;;  %s564_s26 = scalar_lea.vmem (!%p156_p5), [#allocation3], %s354_s24 }
  0x27   : > { %450 = dma.done.wait (%p534_p7), %s162_s25, 2048  }
  0x28   : > { %452 = vsyncadd (%p534_p7), %s162_s25, 4294965248  ;;  %v193_v0 = vld [vmem:[%s653_s1] sm:$0xff]  ;;  %v194_v1 = vld [vmem:[%s653_s1 + $0x8] sm:$0xff]  ;;  %p189_p6 = scmp.lt.s32.totalorder %s513_s2, 1  ;;  %s278_s8 = sld [smem:[#allocation2]] }
  0x29   : > { %225 = vxpose.xlu0.b32.start [1/16] (narrow) %v193_v0, 8  ;;  %v195_v2 = vld [vmem:[%s653_s1 + $0x10] sm:$0xff]  ;;  %v196_v3 = vld [vmem:[%s653_s1 + $0x18] sm:$0xff]  ;;  %v197_v4 = vld [vmem:[%s653_s1 + $0x20] sm:$0xff] }
  0x2a   : > { %v198_v5 = vld [vmem:[%s653_s1 + $0x28] sm:$0xff]  ;;  %v199_v6 = vld [vmem:[%s653_s1 + $0x30] sm:$0xff]  ;;  %v200_v7 = vld [vmem:[%s653_s1 + $0x38] sm:$0xff]  ;;  %s664_s2 = smov (!%p189_p6, %s513_s2), 1 }
  0x2b   : > { %v201_v8 = vld [vmem:[%s653_s1 + $0x40] sm:$0xff]  ;;  %v224_v9 = vld [vmem:[%s564_s26 + $0x78] sm:$0xff]  ;;  %v202_v10 = vld [vmem:[%s653_s1 + $0x48] sm:$0xff]  ;;  %s355_s9 = sshll.u32 %s664_s2, 1 }
  0x2c   : > { %257 = vmatpush.xpose.msra.mxu0 %v224_v9  ;;  %v223_v11 = vld [vmem:[%s564_s26 + $0x70] sm:$0xff]  ;;  %v222_v12 = vld [vmem:[%s564_s26 + $0x68] sm:$0xff]  ;;  %v221_v14 = vld [vmem:[%s564_s26 + $0x60] sm:$0xff]  ;;  %s192_s12 = scalar_lea.vmem %s655_s3, %s355_s9 }
  0x2d   : > { %v203_v13 = vld [vmem:[%s653_s1 + $0x50] sm:$0xff]  ;;  %v220_v15 = vld [vmem:[%s564_s26 + $0x58] sm:$0xff]  ;;  %v218_v18 = vld [vmem:[%s564_s26 + $0x48] sm:$0xff] }
  0x2e   : > { %v204_v16 = vld [vmem:[%s653_s1 + $0x58] sm:$0xff]  ;;  %v219_v17 = vld [vmem:[%s564_s26 + $0x50] sm:$0xff]  ;;  %v205_v19 = vld [vmem:[%s653_s1 + $0x60] sm:$0xff]  ;;  %v279_v33 = vstv %s278_s8 }
  0x2f   : > { %v217_v20 = vld [vmem:[%s564_s26 + $0x40] sm:$0xff]  ;;  %v216_v21 = vld [vmem:[%s564_s26 + $0x38] sm:$0xff]  ;;  %v206_v22 = vld [vmem:[%s653_s1 + $0x68] sm:$0xff] }
  0x30   : > { %258 = vmatpush.xpose.msra.mxu0 %v223_v11  ;;  %v215_v23 = vld [vmem:[%s564_s26 + $0x30] sm:$0xff]  ;;  %v214_v24 = vld [vmem:[%s564_s26 + $0x28] sm:$0xff]  ;;  %v213_v26 = vld [vmem:[%s564_s26 + $0x20] sm:$0xff] }
  0x31   : > { %226 = vxpose.xlu0.b32.cont [2/16] (narrow) %v194_v1, 8  ;;  %v207_v25 = vld [vmem:[%s653_s1 + $0x70] sm:$0xff]  ;;  %v212_v27 = vld [vmem:[%s564_s26 + $0x18] sm:$0xff]  ;;  %v210_v30 = vld [vmem:[%s564_s26 + $0x8] sm:$0xff] }
  0x32   : > { %v208_v28 = vld [vmem:[%s653_s1 + $0x78] sm:$0xff]  ;;  %v211_v29 = vld [vmem:[%s564_s26 + $0x10] sm:$0xff]  ;;  %v209_v31 = vld [vmem:[%s564_s26] sm:$0xff] }
  0x34   : > { %259 = vmatpush.xpose.msra.mxu0 %v222_v12 }
  0x38   : > { %260 = vmatpush.xpose.msra.mxu0 %v221_v14 }
  0x39   : > { %227 = vxpose.xlu0.b32.cont [3/16] (narrow) %v195_v2, 8 }
  0x3c   : > { %261 = vmatpush.xpose.msra.mxu0 %v220_v15 }
  0x40   : > { %262 = vmatpush.xpose.msra.mxu0 %v219_v17 }
  0x41   : > { %228 = vxpose.xlu0.b32.cont [4/16] (narrow) %v196_v3, 8 }
  0x44   : > { %263 = vmatpush.xpose.msra.mxu0 %v218_v18 }
  0x48   : > { %264 = vmatpush.xpose.msra.mxu0 %v217_v20 }
  0x49   : > { %229 = vxpose.xlu0.b32.cont [5/16] (narrow) %v197_v4, 8 }
  0x4c   : > { %265 = vmatpush.xpose.msra.mxu0 %v216_v21 }
  0x50   : > { %266 = vmatpush.xpose.msra.mxu0 %v215_v23 }
  0x51   : > { %230 = vxpose.xlu0.b32.cont [6/16] (narrow) %v198_v5, 8 }
  0x54   : > { %267 = vmatpush.xpose.msra.mxu0 %v214_v24 }
  0x58   : > { %268 = vmatpush.xpose.msra.mxu0 %v213_v26 }
  0x59   : > { %231 = vxpose.xlu0.b32.cont [7/16] (narrow) %v199_v6, 8 }
  0x5c   : > { %269 = vmatpush.xpose.msra.mxu0 %v212_v27 }
  0x60   : > { %270 = vmatpush.xpose.msra.mxu0 %v211_v29 }
  0x61   : > { %232 = vxpose.xlu0.b32.cont [8/16] (narrow) %v200_v7, 8 }
  0x64   : > { %271 = vmatpush.xpose.msra.mxu0 %v210_v30 }
  0x68   : > { %272 = vmatpush.xpose.msra.mxu0 %v209_v31 }
  0x69   : > { %233 = vxpose.xlu0.b32.cont [9/16] (narrow) %v201_v8, 8 }
  0x71   : > { %234 = vxpose.xlu0.b32.cont [10/16] (narrow) %v202_v10, 8 }
  0x79   : > { %235 = vxpose.xlu0.b32.cont [11/16] (narrow) %v203_v13, 8 }
  0x81   : > { %236 = vxpose.xlu0.b32.cont [12/16] (narrow) %v204_v16, 8 }
  0x89   : > { %237 = vxpose.xlu0.b32.cont [13/16] (narrow) %v205_v19, 8 }
  0x91   : > { %238 = vxpose.xlu0.b32.cont [14/16] (narrow) %v206_v22, 8 }
  0x99   : > { %239 = vxpose.xlu0.b32.cont [15/16] (narrow) %v207_v25, 8 }
  0xa1   : > { %240 = vxpose.xlu0.b32.end [16/16] (narrow) %v208_v28, 8 }
  0xcd   : > { %v241_v32 = vpop.trf.xlu0 }
  0xce   : > { %273 = vmatmul.f32.vlgmr.msra.gmra.mxu0 %v241_v32 }
 0x14b   : > { %v274_v34 = vpop.f32.mrf.mxu0 }
 0x14c   : > { %277 = vst [vmem:[%s192_s12] sm:$0x1] %v274_v34  ;;  %v280_v35 = vadd.f32 %v279_v33, %v274_v34 }
 0x14e   : > { %281 = vst [vmem:[%s192_s12] sm:$0x2] %v280_v35 }
 0x14f PF: > { %p14_p7 = scmp.ge.s32.totalorder %s516_s18, 4   ;;  %s659_s14 = smov %s459_s15 }
 0x150   : > { %s660_s15 = smov %s463_s16  ;;  %s661_s16 = smov %s526_s21 }
 0x151   : > { %s662_s17 = smov %s516_s18  ;;  %16 = sbr.rel (!%p14_p7) target bundleno = 5 (0x5), region = 72 }
 0x156   :  { %301 = vsyncpa [#allocation4], 1 }
 0x157   :  { %303 = vsyncpa [#allocation4 + $0x1], 1 }

</bundles_post_ra>
